<compile_context>
chip_gen: v7x
topology: tpu7x:2x2x1
jax: 0.10.0
libtpu: 0.0.40
codegen_flags: <defaults>
</compile_context>

<pallas_src>
import functools

import jax
import jax.numpy as jnp
from jax import lax
from jax.experimental import pallas as pl
from jax.experimental.pallas import tpu as pltpu


# ---------------------------------------------------------------------------
# Kernels (specialized at trace time).
# ---------------------------------------------------------------------------

def _clean_kernel(x_ref, p_ref, o_ref):
    # x_ref: (row_tile, chw_tile); p_ref: (1, chw_tile) broadcast over sublanes.
    o_ref[...] = (x_ref[...] + p_ref[...]).astype(o_ref.dtype)


def _make_backdoor_kernel(row_tile, pois_num):
    def kernel(x_ref, p_ref, pbd_ref, o_ref):
        # Grid = (n_chw, n_rows): axis 1 indexes batch-row tiles.
        row0 = pl.program_id(1) * row_tile
        all_bd = (row0 + row_tile) <= pois_num   # whole block is poisoned
        all_clean = row0 >= pois_num             # whole block is clean

        @pl.when(all_bd)
        def _():
            o_ref[...] = (x_ref[...] + pbd_ref[...]).astype(o_ref.dtype)

        @pl.when(all_clean)
        def _():
            o_ref[...] = (x_ref[...] + p_ref[...]).astype(o_ref.dtype)

        @pl.when(jnp.logical_and(jnp.logical_not(all_bd),
                                 jnp.logical_not(all_clean)))
        def _():
            # Only the single block that straddles pois_num pays for the
            # per-row select.
            row_ids = row0 + lax.broadcasted_iota(jnp.int32, (row_tile, 1), 0)
            add = jnp.where(row_ids < pois_num, pbd_ref[...], p_ref[...])
            o_ref[...] = (x_ref[...] + add).astype(o_ref.dtype)

    return kernel


# ---------------------------------------------------------------------------
# Tiling plan.
# ---------------------------------------------------------------------------

def _tile_plan(B, CHW, itemsize, budget_bytes, row_tile=None):
    """Pick (row_tile, chw_tile) for lane-dense blocks within a VMEM budget."""
    sub = max(8, 32 // itemsize)            # sublane multiple: f32->8, bf16->16, i8->32
    bytes_per_row = CHW * itemsize

    if row_tile is not None:
        row_tile = min(int(row_tile), B)
        if row_tile < B:
            row_tile = min(B, max(sub, (row_tile // sub) * sub))
    else:
        rows_fit = max(1, budget_bytes // max(1, bytes_per_row))
        if rows_fit < sub:
            # Rows are huge; take a minimal sublane block and tile CHW below.
            row_tile = min(B, sub)
        else:
            row_tile = min(B, rows_fit)
            if B > 2 * sub:
                # Keep >= 2 grid steps so v7x's 2 TensorCores both get work.
                half = -(-B // 2)
                half = -(-half // sub) * sub
                row_tile = min(row_tile, half)
            if row_tile < B:
                row_tile = min(B, max(sub, (row_tile // sub) * sub))

    # Full-CHW blocks if they fit (or CHW is too small to split); otherwise
    # tile CHW in multiples of 128 so stores stay unmasked and lane-dense.
    if row_tile * bytes_per_row <= budget_bytes or CHW <= 128:
        chw_tile = CHW
    else:
        lanes_fit = max(128, budget_bytes // max(1, row_tile * itemsize))
        chw_tile = min(CHW, (lanes_fit // 128) * 128)
        chw_tile = max(128, chw_tile)
    return row_tile, chw_tile


# ---------------------------------------------------------------------------
# Forward wrapper.
# ---------------------------------------------------------------------------

def pois_pad_prompter_forward(x, params, eps_norm, is_backdoor=False,
                              eval_mode=False, row_tile=None,
                              block_budget_bytes=8 * 1024 * 1024):
    """Functional equivalent of PoisPadPrompter.forward."""
    # TODO(synk): the PyTorch module clamps pad_trigger.data in place (a
    # persistent parameter mutation); here the clamped value is only used
    # transiently for this forward pass.
    B, C, H, W = x.shape
    pad_up = params["pad_up"]
    pad_down = params["pad_down"]
    pad_left = params["pad_left"]
    pad_right = params["pad_right"]
    pad_trigger = params["pad_trigger"]

    pad_size = pad_up.shape[2]
    base_size = H - 2 * pad_size

    # Assemble the prompt frame once (tiny, plain-JAX glue): (1, C, H, W).
    base = jnp.zeros((1, C, base_size, base_size), dtype=x.dtype)
    mid = jnp.concatenate([pad_left, base, pad_right], axis=3)
    prompt = jnp.concatenate([pad_up, mid, pad_down], axis=2).astype(x.dtype)

    # Flatten to a lane-dense layout: last dim = C*H*W.
    CHW = C * H * W
    x_flat = x.reshape(B, CHW)
    prompt_flat = prompt.reshape(1, CHW)

    row_tile, chw_tile = _tile_plan(B, CHW, x.dtype.itemsize,
                                    block_budget_bytes, row_tile)
    grid = (pl.cdiv(CHW, chw_tile), pl.cdiv(B, row_tile))

    # Blocks: x/out stream one (row_tile, chw_tile) tile per grid step; the
    # prompt rows use an index_map constant along the (inner) row axis so they
    # stay VMEM-resident across the whole batch sweep.
    x_spec = pl.BlockSpec((row_tile, chw_tile), lambda j, i: (i, j))
    row_spec = pl.BlockSpec((1, chw_tile), lambda j, i: (0, j))
    out_spec = pl.BlockSpec((row_tile, chw_tile), lambda j, i: (i, j))

    if is_backdoor:
        # pois_num semantics from the module: 50 while training, batch size at
        # eval. Both are Python ints -> baked into the kernel at trace time.
        pois_num = B if eval_mode else 50
        # Per-channel eps clamp of the trigger in f32 (matches torch.clamp on
        # the f32 parameter), hoisted out of the kernel; then pre-sum with the
        # prompt so most blocks do a single add.
        # TODO(synk): torch.clamp with a Python-list min/max is ill-typed in
        # the original module; we implement the evident per-channel clamp.
        eps = jnp.asarray(eps_norm, dtype=jnp.float32).reshape(1, C, 1, 1)
        trig = jnp.clip(pad_trigger.astype(jnp.float32), -eps, eps).astype(x.dtype)
        prompt_bd_flat = (prompt + trig).reshape(1, CHW)

        kernel = _make_backdoor_kernel(row_tile, pois_num)
        in_specs = [x_spec, row_spec, row_spec]
        inputs = (x_flat, prompt_flat, prompt_bd_flat)
    else:
        kernel = _clean_kernel
        in_specs = [x_spec, row_spec]
        inputs = (x_flat, prompt_flat)

    out_flat = pl.pallas_call(
        kernel,
        out_shape=jax.ShapeDtypeStruct((B, CHW), x.dtype),
        grid=grid,
        in_specs=in_specs,
        out_specs=out_spec,
        compiler_params=pltpu.CompilerParams(
            dimension_semantics=("parallel", "parallel"),
            vmem_limit_bytes=48 * 1024 * 1024),
        # TODO(synk): if the caller can donate x, input_output_aliases would
        # save the output HBM allocation (footprint/donation only -- the DMA
        # traffic floor stays 2*B*CHW*itemsize either way).
    )(*inputs)

    return out_flat.reshape(B, C, H, W)


# ---------------------------------------------------------------------------
# Plain-JAX reference (mirrors the PyTorch forward).
# ---------------------------------------------------------------------------

def _reference_forward(x, params, eps_norm, is_backdoor=False, eval_mode=False):
    B, C, H, W = x.shape
    pad_size = params["pad_up"].shape[2]
    base_size = H - 2 * pad_size
    base = jnp.zeros((1, C, base_size, base_size), dtype=x.dtype)
    mid = jnp.concatenate([params["pad_left"], base, params["pad_right"]], axis=3)
    prompt = jnp.concatenate([params["pad_up"], mid, params["pad_down"]], axis=2)
    prompt = jnp.tile(prompt, (B, 1, 1, 1))
    if is_backdoor:
        pois_num = B if eval_mode else 50
        eps = jnp.asarray(eps_norm, dtype=jnp.float32).reshape(1, C, 1, 1)
        trig = jnp.clip(params["pad_trigger"], -eps, eps)
        mask = (jnp.arange(B) < pois_num).reshape(B, 1, 1, 1)
        prompt = prompt + jnp.where(mask, trig, 0.0)
    return x + prompt


if __name__ == "__main__":
    # Small config consistent with the module: image_size=16, prompt_size=4, C=3.
    channels, image_size, pad_size = 3, 16, 4
    base_size = image_size - 2 * pad_size

    mean = (0.48145466, 0.4578275, 0.40821073)
    std = (0.26862954, 0.26130258, 0.27577711)
    eps_raw = (0.5, 0.5, 0.5)                       # args.eps = "(0.5, 0.5, 0.5)"
    eps_norm = [(e - m) / s for e, m, s in zip(eps_raw, mean, std)]

    key = jax.random.PRNGKey(0)
    k_up, k_dn, k_lf, k_rt, k_tr, k_x, k_x2 = jax.random.split(key, 7)
    params = {
        "pad_up": jax.random.normal(k_up, (1, channels, pad_size, image_size), jnp.float32),
        "pad_down": jax.random.normal(k_dn, (1, channels, pad_size, image_size), jnp.float32),
        "pad_left": jax.random.normal(k_lf, (1, channels, base_size, pad_size), jnp.float32),
        "pad_right": jax.random.normal(k_rt, (1, channels, base_size, pad_size), jnp.float32),
        "pad_trigger": jax.random.normal(k_tr, (1, channels, image_size, image_size), jnp.float32),
    }

    # --- small batch: clean path and backdoor/eval path (single-block grid) ---
    batch = 2
    x = jax.random.normal(k_x, (batch, channels, image_size, image_size), jnp.float32)

    out_clean = pois_pad_prompter_forward(x, params, eps_norm,
                                          is_backdoor=False, eval_mode=False)
    out_clean = jax.block_until_ready(out_clean)
    ref_clean = _reference_forward(x, params, eps_norm, is_backdoor=False)

    out_bd = pois_pad_prompter_forward(x, params, eps_norm,
                                       is_backdoor=True, eval_mode=True)
    out_bd = jax.block_until_ready(out_bd)
    ref_bd = _reference_forward(x, params, eps_norm, is_backdoor=True, eval_mode=True)

    assert out_clean.shape == x.shape and out_clean.dtype == x.dtype
    assert jnp.allclose(out_clean, ref_clean, atol=1e-5, rtol=1e-5)
    assert jnp.allclose(out_bd, ref_bd, atol=1e-5, rtol=1e-5)

    # --- larger batch: training backdoor path (pois_num=50 < B), multi-step
    #     row grid with an uneven last tile and a mask boundary inside a block ---
    batch2 = 60
    x2 = jax.random.normal(k_x2, (batch2, channels, image_size, image_size), jnp.float32)
    out_bd_tr = pois_pad_prompter_forward(x2, params, eps_norm,
                                          is_backdoor=True, eval_mode=False,
                                          row_tile=8)
    out_bd_tr = jax.block_until_ready(out_bd_tr)
    ref_bd_tr = _reference_forward(x2, params, eps_norm,
                                   is_backdoor=True, eval_mode=False)
    assert jnp.allclose(out_bd_tr, ref_bd_tr, atol=1e-5, rtol=1e-5)

    # --- tiny VMEM budget: exercise the CHW-tiling fallback (2-D grid with a
    #     partial last lane-tile) on the backdoor/training path ---
    out_bd_chw = pois_pad_prompter_forward(x2, params, eps_norm,
                                           is_backdoor=True, eval_mode=False,
                                           block_budget_bytes=16 * 1024)
    out_bd_chw = jax.block_until_ready(out_bd_chw)
    assert jnp.allclose(out_bd_chw, ref_bd_tr, atol=1e-5, rtol=1e-5)

    # --- auto tiling on the larger batch (clean path) ---
    out_clean2 = pois_pad_prompter_forward(x2, params, eps_norm,
                                           is_backdoor=False, eval_mode=False)
    out_clean2 = jax.block_until_ready(out_clean2)
    ref_clean2 = _reference_forward(x2, params, eps_norm, is_backdoor=False)
    assert jnp.allclose(out_clean2, ref_clean2, atol=1e-5, rtol=1e-5)

    print("KERNEL_OK")
</pallas_src>

<mosaic_0001>
module attributes {stable_mosaic.version = 11 : i64} {
  func.func @_clean_kernel(%arg0: i32, %arg1: i32, %arg2: memref<2x768xf32, #tpu.memory_space<vmem>>, %arg3: memref<1x768xf32, #tpu.memory_space<vmem>>, %arg4: memref<2x768xf32, #tpu.memory_space<vmem>>) attributes {dimension_semantics = [#tpu.dimension_semantics<parallel>, #tpu.dimension_semantics<parallel>], iteration_bounds = array<i64: 1, 1>, scalar_prefetch = 0 : i64, scratch_operands = 0 : i64, tpu.core_type = #tpu.core_type<tc>, window_params = [{transform_indices = @transform_0, window_bounds = array<i64: 2, 768>}, {transform_indices = @transform_1, window_bounds = array<i64: 1, 768>}, {transform_indices = @transform_2, window_bounds = array<i64: 2, 768>}]} {
    %c0 = arith.constant 0 : index
    %c0_0 = arith.constant 0 : index
    %0 = vector.load %arg2[%c0, %c0_0] : memref<2x768xf32, #tpu.memory_space<vmem>>, vector<2x768xf32>
    %c0_1 = arith.constant 0 : index
    %c0_2 = arith.constant 0 : index
    %1 = vector.load %arg3[%c0_1, %c0_2] : memref<1x768xf32, #tpu.memory_space<vmem>>, vector<1x768xf32>
    %2 = vector.broadcast %1 : vector<1x768xf32> to vector<2x768xf32>
    %3 = arith.addf %0, %2 : vector<2x768xf32>
    %c0_3 = arith.constant 0 : index
    %c0_4 = arith.constant 0 : index
    %4 = vector.load %arg4[%c0_3, %c0_4] : memref<2x768xf32, #tpu.memory_space<vmem>>, vector<2x768xf32>
    tpu.vector_store %arg4[%c0_3, %c0_4], %3 {strides = array<i32>} : memref<2x768xf32, #tpu.memory_space<vmem>>, vector<2x768xf32>,
    return
  }
  func.func @transform_0(%arg0: i32, %arg1: i32) -> (i32, i32) {
    %c0_i32 = arith.constant 0 : i32
    return %arg1, %arg0 : i32, i32
  }
  func.func @transform_1(%arg0: i32, %arg1: i32) -> (i32, i32) {
    %c0_i32 = arith.constant 0 : i32
    %c0_i32_0 = arith.constant 0 : i32
    return %c0_i32, %arg0 : i32, i32
  }
  func.func @transform_2(%arg0: i32, %arg1: i32) -> (i32, i32) {
    %c0_i32 = arith.constant 0 : i32
    return %arg1, %arg0 : i32, i32
  }
}

</mosaic_0001>

<bundles_post_ra>
// kernel: tpu_custom_call.1
= control target key start
LH: loop header
LB: loop body
LE: loop exit
PB: predicated region body
PF: predicated region fallthrough
CT: control target
= control target key end

     0   :  { %7 = vsyncpa [#allocation3], 0  ;;  %s242_s0 = inlined_call_operand.hbm [shape: f32[2,768], index: 0, kind: input, shape index: {}]   ;;  %s243_s1 = inlined_call_operand.hbm [shape: f32[1,768], index: 1, kind: input, shape index: {}]   ;;  %s244_s2 = inlined_call_operand.hbm [shape: f32[2,768], index: 2, kind: output, shape index: {}]  }
   0x1   :  { %8 = vsyncpa [#allocation6], 0 }
   0x2   :  { %9 = vsyncpa [#allocation4], 0  ;;  %s187_s9 = smov [#allocation2]   ;;  %s188_s11 = smov [#allocation5]  }
   0x3   :  { %s16_s10 = sshll.u32 %s187_s9, 4  ;;  %s26_s12 = sshll.u32 %s188_s11, 4  ;;  %s17_s10 = int_to_ptr.vmem [resolvable:$true] %s16_s10  ;;  %s27_s12 = int_to_ptr.vmem [resolvable:$true] %s26_s12 }
   0x4   :  { %s115_s15 = scalar_lea.hbm %s242_s0, 192 }
   0x5   :  { %p116_p0 = scmp.ne.s32.totalorder %s242_s0, %s115_s15  ;;  %p119_p1 = scmp.lt.u32.totalorder %s115_s15, %s242_s0 }
   0x7   :  { %p121_p2 = pnand %p119_p1, %p116_p0 }
   0x9   :  { %124 = shalt.err (!%p121_p2)
}
   0xa   :  { %s125_s20 = scalar_lea.vmem %s17_s10, 192  ;;  %p130_p4 = scmp.lt.s32.totalorder %s17_s10, %s17_s10 }
   0xb   :  { %p126_p3 = scmp.ne.s32.totalorder %s17_s10, %s125_s20  ;;  %p131_p5 = scmp.lt.s32.totalorder %s125_s20, %s125_s20 }
   0xd   :  { %p132_p6 = por %p131_p5, %p130_p4 }
   0xf   :  { %p133_p7 = pnand %p132_p6, %p126_p3 }
  0x11   :  { %136 = shalt.err (!%p133_p7)
}
  0x12   :  { %19 = dma.hbm_to_vmem [thread:$0]  %s242_s0, 192, %s17_s10, [#allocation3]  }
  0x13   :  { %s137_s25 = scalar_lea.hbm %s243_s1, 96 }
  0x14   :  { %p138_p8 = scmp.ne.s32.totalorder %s243_s1, %s137_s25  ;;  %p141_p9 = scmp.lt.u32.totalorder %s137_s25, %s243_s1 }
  0x16   :  { %p143_p10 = pnand %p141_p9, %p138_p8 }
  0x18   :  { %146 = shalt.err (!%p143_p10)
}
  0x19   :  { %s147_s30 = scalar_lea.vmem %s27_s12, 96  ;;  %p152_p12 = scmp.lt.s32.totalorder %s27_s12, %s27_s12 }
  0x1a   :  { %p148_p11 = scmp.ne.s32.totalorder %s27_s12, %s147_s30  ;;  %p153_p13 = scmp.lt.s32.totalorder %s147_s30, %s147_s30 }
  0x1c   :  { %p154_p0 = por %p153_p13, %p152_p12 }
  0x1e   :  { %p155_p1 = pnand %p154_p0, %p148_p11 }
  0x20   :  { %158 = shalt.err (!%p155_p1)
}
  0x21   :  { %29 = dma.hbm_to_vmem [thread:$0]  %s243_s1, 96, %s27_s12, [#allocation6]  }
  0x22   :  { %181 = dma.done.wait [#allocation3], 192  }
  0x23   :  { %182 = vsyncadd [#allocation3], 4294967104 }
  0x24   :  { %183 = dma.done.wait [#allocation6], 96  }
  0x25   :  { %184 = vsyncadd [#allocation6], 4294967200  ;;  %v40_v0 = vlaneseq  ;;  %v189_v1 = vmov 1983009808   ;;  %v38_v11 = vld [vmem:[#allocation5] sm:$0x3f] }
  0x26   :  { %v67_v2 = vunpack.c.l.s4 %v189_v1  ;;  %v37_v24 = vld [vmem:[#allocation2 + $0x8] sm:$0xf]  ;;  %v36_v25 = vld [vmem:[#allocation2] sm:$0xff]  ;;  %s190_s1 = smov [#allocation7]  }
  0x27   :  { %v41_v3 = vshrl.u32 %v40_v0, 7  ;;  %s101_s4 = sshll.u32 %s190_s1, 4  ;;  %s102_s4 = int_to_ptr.vmem [resolvable:$true] %s101_s4 }
  0x28   :  { %v68_v4 = vunpack.c.0.s8 %v67_v2  ;;  %s159_s5 = scalar_lea.vmem %s102_s4, 192  ;;  %p164_p3 = scmp.lt.s32.totalorder %s102_s4, %s102_s4 }
  0x29   :  { %v42_v5 = vsub.s32 0, %v41_v3  ;;  %v46_v6 = vsub.s32 1, %v41_v3  ;;  %v50_v7 = vsub.s32 2, %v41_v3  ;;  %v54_v8 = vsub.s32 3, %v41_v3  ;;  %p160_p2 = scmp.ne.s32.totalorder %s102_s4, %s159_s5  ;;  %p165_p4 = scmp.lt.s32.totalorder %s159_s5, %s159_s5 }
  0x2a   :  { %v58_v9 = vsub.s32 4, %v41_v3  ;;  %v62_v10 = vsub.s32 5, %v41_v3  ;;  %v71_v12 = vsub.s32 %v68_v4, %v41_v3 }
  0x2b   :  { %v43_v13 = vrot.slane %v38_v11, %v42_v5  ;;  %v47_v14 = vrot.slane %v38_v11, %v46_v6  ;;  %v51_v15 = vrot.slane %v38_v11, %v50_v7  ;;  %v55_v16 = vrot.slane %v38_v11, %v54_v8  ;;  %p166_p5 = por %p165_p4, %p164_p3 }
  0x2c   :  { %v59_v17 = vrot.slane %v38_v11, %v58_v9  ;;  %v63_v18 = vrot.slane %v38_v11, %v62_v10 }
  0x2d   :  { %v64_v19 = vcombine.low %v43_v13, %v47_v14  ;;  %v65_v20 = vcombine.low %v51_v15, %v55_v16  ;;  %p167_p6 = pnand %p166_p5, %p160_p2 }
  0x2e   :  { %v81_v21 = vcombine.low %v59_v17, %v63_v18 }
  0x2f   :  { %v72_v22 = vrot.slane %v64_v19, %v71_v12  ;;  %v79_v23 = vrot.slane %v65_v20, %v71_v12 }
  0x30   :  { %v88_v26 = vrot.slane %v81_v21, %v71_v12 }
  0x31   :  { %v80_v27 = vcombine.low %v72_v22, %v79_v23 }
  0x32   :  { %v92_v28 = vadd.f32 %v88_v26, %v37_v24 }
  0x33   :  { %v91_v29 = vadd.f32 %v80_v27, %v36_v25 }
  0x34   :  { %94 = vst [vmem:[#allocation7 + $0x8] sm:$0xf] %v92_v28 }
  0x35   :  { %93 = vst [vmem:[#allocation7] sm:$0xff] %v91_v29 }
  0x36   :  { %170 = shalt.err (!%p167_p6)
}
  0x37   :  { %s171_s8 = scalar_lea.hbm %s244_s2, 192 }
  0x38   :  { %p172_p7 = scmp.ne.s32.totalorder %s244_s2, %s171_s8  ;;  %p175_p8 = scmp.lt.u32.totalorder %s171_s8, %s244_s2 }
  0x3a   :  { %p177_p9 = pnand %p175_p8, %p172_p7 }
  0x3c   :  { %180 = shalt.err (!%p177_p9)
}
  0x3d   :  { %104 = dma.vmem_to_hbm [thread:$0]  %s102_s4, 192, %s244_s2, [#allocation4]  }
  0x3e   :  { %185 = dma.done.wait [#allocation4], 192  }
  0x3f   :  { %186 = vsyncadd [#allocation4], 4294967104 }
  0x40   :  { %108 = vsyncpa [#allocation3], 1 }
  0x41   :  { %109 = vsyncpa [#allocation6], 1 }
  0x42   :  { %110 = vsyncpa [#allocation4], 1 }

</bundles_post_ra>
